<compile_context>
chip_gen: v7x
topology: tpu7x:2x2x1
jax: 0.10.0
libtpu: 0.0.40
codegen_flags: <defaults>
</compile_context>

<pallas_src>
import functools

import jax
import jax.numpy as jnp
from jax.experimental import pallas as pl
from jax.experimental.pallas import tpu as pltpu


# ----------------------------- Pallas kernel ------------------------------ #

def _abc_mlp_kernel(*refs, n_layers):
    """Fused abcMLP forward for one batch tile.

    refs layout: (x_ref, A0_ref, b0_ref, A1_ref, b1_ref, ..., o_ref)
    A_i already has n^{-a} folded in (stored in the matmul dtype, e.g. bf16);
    b_i already has bias_tune folded in (f32).  Hidden layers get ReLU.
    """
    x_ref = refs[0]
    o_ref = refs[-1]
    layer_refs = refs[1:-1]                      # alternating A_i, bias_i

    h = x_ref[...]                               # [Bt, D_in] f32
    for i in range(n_layers):
        A = layer_refs[2 * i][...]               # [D_in_i, D_out_i] (bf16)
        b = layer_refs[2 * i + 1][...]           # [1, D_out_i]      (f32)

        # MXU: bf16 x bf16 -> f32 accumulation.  Elementwise stays f32.
        y = jnp.dot(h.astype(A.dtype), A, preferred_element_type=jnp.float32)
        y = y + b
        if i < n_layers - 1:                     # hidden-layer activation
            y = jnp.maximum(y, 0.0)
        h = y

    o_ref[...] = h.astype(o_ref.dtype)


# ------------------------------ VMEM budget -------------------------------- #

def _vmem_limit_bytes(b_tile, d_in, fused_params):
    """Explicit scoped-VMEM budget: resident weights/biases + double-buffered
    x/out tiles + live activations, 2x headroom, clamped to v7x's 64 MiB."""
    w = sum(p["A"].shape[0] * p["A"].shape[1] * jnp.dtype(p["A"].dtype).itemsize
            for p in fused_params)
    b = sum(p["bias"].shape[1] * 4 for p in fused_params)
    widest = max([d_in] + [p["A"].shape[1] for p in fused_params])
    d_out = fused_params[-1]["A"].shape[1]
    io = 2 * b_tile * (d_in + d_out) * 4          # double-buffered x / out tiles
    acts = 2 * b_tile * widest * 4                # live intermediates in f32
    need = w + b + io + acts
    return int(min(max(2 * need, 16 * 1024 * 1024), 64 * 1024 * 1024))


# ------------------------------ Forward call -------------------------------- #

def abc_mlp_forward(x, fused_params, *, b_tile=512):
    """NNModel.forward as one fused Pallas TPU kernel.

    x:            [B, d_in] float32
    fused_params: list of {"A": [din, dout] (bf16, n^{-a} folded in),
                           "bias": [1, dout] (f32, bias_tune folded in)}
    """
    n_layers = len(fused_params)
    B, d_in = x.shape
    d_out = fused_params[-1]["A"].shape[1]

    # Batch tile: whole batch if it is small, otherwise a 256-aligned tile
    # (v6e/v7x MXU-friendly; also a multiple of 128 for v5e).
    if B <= b_tile:
        bt = B
    else:
        bt = min(b_tile, (B // 256) * 256) if B >= 256 else B
        bt = max(bt, 8)
    grid = (pl.cdiv(B, bt),)

    # Flat operand list: x, A0, b0, A1, b1, ...
    inputs = [x]
    in_specs = [pl.BlockSpec((bt, d_in), lambda i: (i, 0))]
    for p in fused_params:
        A, bias = p["A"], p["bias"]
        inputs.append(A)
        in_specs.append(pl.BlockSpec(A.shape, lambda i: (0, 0)))     # resident
        inputs.append(bias)
        in_specs.append(pl.BlockSpec(bias.shape, lambda i: (0, 0)))  # resident
    # TODO(synk): if d_out stops being tiny, pad it to a multiple of 128 here
    # (lane-dense output slab) and slice outside the kernel.
    out_specs = pl.BlockSpec((bt, d_out), lambda i: (i, 0))

    kernel = functools.partial(_abc_mlp_kernel, n_layers=n_layers)

    return pl.pallas_call(
        kernel,
        grid=grid,
        in_specs=in_specs,
        out_specs=out_specs,
        out_shape=jax.ShapeDtypeStruct((B, d_out), jnp.float32),
        compiler_params=pltpu.CompilerParams(
            dimension_semantics=("parallel",),          # shards batch across v7x's 2 TCs
            vmem_limit_bytes=_vmem_limit_bytes(bt, d_in, fused_params),
        ),
    )(*inputs)


# -------------------------- Model (param setup) ---------------------------- #

def init_abc_mlp_params(key, d_in, d_out, width, depth, list_b, bias_tune=1.0):
    """Gaussian init mirroring abc_Layer.initialize_parameters:
       A ~ N(0,1) * input_width**(-b),  bias ~ N(0,1),  bias_tune = ones(1)*bias_tune.
    """
    dims = []
    for i in range(depth):
        if depth == 1:
            dims.append((d_in, d_out))
        elif i == 0:
            dims.append((d_in, width))
        elif i < depth - 1:
            dims.append((width, width))
        else:
            dims.append((width, d_out))

    params = []
    for i, (din, dout) in enumerate(dims):
        key, ka, kb = jax.random.split(key, 3)
        A = jax.random.normal(ka, (din, dout), dtype=jnp.float32) * (din ** (-list_b[i]))
        bias = jax.random.normal(kb, (dout,), dtype=jnp.float32)
        params.append({
            "A": A,
            "bias": bias,
            "bias_tune": jnp.ones((1,), jnp.float32) * bias_tune,  # array, like torch Parameter
        })
    return params


def prepare_fused_params(params, list_a, matmul_dtype=jnp.bfloat16):
    """ONE-TIME transform (call once, outside the hot path):
       A'    = A * input_width**(-a)    (cast to the matmul dtype)
       bias' = bias * bias_tune         (kept f32, reshaped to [1, dout])
    Works on concrete or traced arrays — no float() on pytree leaves."""
    fused = []
    for i, p in enumerate(params):
        din = p["A"].shape[0]
        scale = float(din) ** (-float(list_a[i]))          # list_a is static Python config
        A = (p["A"].astype(jnp.float32) * scale).astype(matmul_dtype)
        bias = (p["bias"].astype(jnp.float32) * p["bias_tune"]).reshape(1, -1)
        fused.append({"A": A, "bias": bias})
    return fused


# ---------------------------------- main ----------------------------------- #

if __name__ == "__main__":
    # Small architecture consistent with the abcMLP config:
    #   d_in=16, width=32, d_out=8, depth=3
    d_in, width, d_out, depth = 16, 32, 8, 3
    batch = 8
    # abc-parametrization constants per layer (paper notation).
    list_a = [0.0, 0.5, 0.5]
    list_b = [0.0, 0.5, 0.5]

    key = jax.random.PRNGKey(0)
    key, kx = jax.random.split(key)
    x = jax.random.normal(kx, (batch, d_in), dtype=jnp.float32)

    params = init_abc_mlp_params(key, d_in, d_out, width, depth, list_b)

    # One-time parameter transform (outside jit -> zero per-call cost).
    fused_params = prepare_fused_params(params, list_a, matmul_dtype=jnp.bfloat16)

    fwd = jax.jit(abc_mlp_forward)
    out = jax.block_until_ready(fwd(x, fused_params))
    assert out.shape == (batch, d_out)

    # Reference 1: mirrors the kernel numerics exactly (bf16 MXU inputs,
    # f32 accumulation) using the same fused parameters.
    h = x
    for i, p in enumerate(fused_params):
        y = jnp.dot(h.astype(p["A"].dtype), p["A"],
                    preferred_element_type=jnp.float32) + p["bias"]
        if i < depth - 1:
            y = jnp.maximum(y, 0.0)
        h = y
    assert jnp.allclose(out, h, atol=1e-4, rtol=1e-4)

    # Reference 2: loose semantic check against the original f32 abcMLP formula
    # (difference is only the bf16 rounding of the MXU inputs).
    ref = x
    for i, p in enumerate(params):
        din = ref.shape[1]
        ref = ref @ p["A"] * (din ** (-list_a[i])) + p["bias"] * p["bias_tune"]
        if i < depth - 1:
            ref = jnp.maximum(ref, 0.0)
    assert jnp.allclose(out, ref, atol=1e-1, rtol=1e-1)

    print("KERNEL_OK")
</pallas_src>

<mosaic_0001>
module attributes {stable_mosaic.version = 11 : i64} {
  func.func @_abc_mlp_kernel(%arg0: i32, %arg1: memref<8x16xf32, #tpu.memory_space<vmem>>, %arg2: memref<16x32xbf16, #tpu.memory_space<vmem>>, %arg3: memref<1x32xf32, #tpu.memory_space<vmem>>, %arg4: memref<32x32xbf16, #tpu.memory_space<vmem>>, %arg5: memref<1x32xf32, #tpu.memory_space<vmem>>, %arg6: memref<32x8xbf16, #tpu.memory_space<vmem>>, %arg7: memref<1x8xf32, #tpu.memory_space<vmem>>, %arg8: memref<8x8xf32, #tpu.memory_space<vmem>>) attributes {dimension_semantics = [#tpu.dimension_semantics<parallel>], iteration_bounds = array<i64: 1>, scalar_prefetch = 0 : i64, scratch_operands = 0 : i64, tpu.core_type = #tpu.core_type<tc>, window_params = [{transform_indices = @transform_0, window_bounds = array<i64: 8, 16>}, {pipeline_mode = #tpu.pipeline_mode<synchronous>, transform_indices = @transform_1, window_bounds = array<i64: 16, 32>}, {pipeline_mode = #tpu.pipeline_mode<synchronous>, transform_indices = @transform_2, window_bounds = array<i64: 1, 32>}, {pipeline_mode = #tpu.pipeline_mode<synchronous>, transform_indices = @transform_3, window_bounds = array<i64: 32, 32>}, {pipeline_mode = #tpu.pipeline_mode<synchronous>, transform_indices = @transform_4, window_bounds = array<i64: 1, 32>}, {pipeline_mode = #tpu.pipeline_mode<synchronous>, transform_indices = @transform_5, window_bounds = array<i64: 32, 8>}, {pipeline_mode = #tpu.pipeline_mode<synchronous>, transform_indices = @transform_6, window_bounds = array<i64: 1, 8>}, {transform_indices = @transform_7, window_bounds = array<i64: 8, 8>}]} {
    %c0 = arith.constant 0 : index
    %c0_0 = arith.constant 0 : index
    %0 = vector.load %arg1[%c0, %c0_0] : memref<8x16xf32, #tpu.memory_space<vmem>>, vector<8x16xf32>
    %c0_1 = arith.constant 0 : index
    %c0_2 = arith.constant 0 : index
    %1 = vector.load %arg2[%c0_1, %c0_2] : memref<16x32xbf16, #tpu.memory_space<vmem>>, vector<16x32xbf16>
    %c0_3 = arith.constant 0 : index
    %c0_4 = arith.constant 0 : index
    %2 = vector.load %arg3[%c0_3, %c0_4] : memref<1x32xf32, #tpu.memory_space<vmem>>, vector<1x32xf32>
    %3 = arith.truncf %0 : vector<8x16xf32> to vector<8x16xbf16>
    %cst = arith.constant dense<0.000000e+00> : vector<8x32xf32>
    %4 = tpu.matmul %3, %1, %cst {dimension_numbers = #tpu.dot_dimension_numbers<[1], [0], [0], [1], [0, 0, 1, 1], [], []>} : vector<8x16xbf16>, vector<16x32xbf16>, vector<8x32xf32> -> vector<8x32xf32>
    %5 = vector.broadcast %2 : vector<1x32xf32> to vector<8x32xf32>
    %6 = arith.addf %4, %5 : vector<8x32xf32>
    %cst_5 = arith.constant 0.000000e+00 : f32
    %7 = vector.broadcast %cst_5 : f32 to vector<8x32xf32>
    %8 = arith.maximumf %6, %7 : vector<8x32xf32>
    %c0_6 = arith.constant 0 : index
    %c0_7 = arith.constant 0 : index
    %9 = vector.load %arg4[%c0_6, %c0_7] : memref<32x32xbf16, #tpu.memory_space<vmem>>, vector<32x32xbf16>
    %c0_8 = arith.constant 0 : index
    %c0_9 = arith.constant 0 : index
    %10 = vector.load %arg5[%c0_8, %c0_9] : memref<1x32xf32, #tpu.memory_space<vmem>>, vector<1x32xf32>
    %11 = arith.truncf %8 : vector<8x32xf32> to vector<8x32xbf16>
    %cst_10 = arith.constant dense<0.000000e+00> : vector<8x32xf32>
    %12 = tpu.matmul %11, %9, %cst_10 {dimension_numbers = #tpu.dot_dimension_numbers<[1], [0], [0], [1], [0, 0, 1, 1], [], []>} : vector<8x32xbf16>, vector<32x32xbf16>, vector<8x32xf32> -> vector<8x32xf32>
    %13 = vector.broadcast %10 : vector<1x32xf32> to vector<8x32xf32>
    %14 = arith.addf %12, %13 : vector<8x32xf32>
    %cst_11 = arith.constant 0.000000e+00 : f32
    %15 = vector.broadcast %cst_11 : f32 to vector<8x32xf32>
    %16 = arith.maximumf %14, %15 : vector<8x32xf32>
    %c0_12 = arith.constant 0 : index
    %c0_13 = arith.constant 0 : index
    %17 = vector.load %arg6[%c0_12, %c0_13] : memref<32x8xbf16, #tpu.memory_space<vmem>>, vector<32x8xbf16>
    %c0_14 = arith.constant 0 : index
    %c0_15 = arith.constant 0 : index
    %18 = vector.load %arg7[%c0_14, %c0_15] : memref<1x8xf32, #tpu.memory_space<vmem>>, vector<1x8xf32>
    %19 = arith.truncf %16 : vector<8x32xf32> to vector<8x32xbf16>
    %cst_16 = arith.constant dense<0.000000e+00> : vector<8x8xf32>
    %20 = tpu.matmul %19, %17, %cst_16 {dimension_numbers = #tpu.dot_dimension_numbers<[1], [0], [0], [1], [0, 0, 1, 1], [], []>} : vector<8x32xbf16>, vector<32x8xbf16>, vector<8x8xf32> -> vector<8x8xf32>
    %21 = vector.broadcast %18 : vector<1x8xf32> to vector<8x8xf32>
    %22 = arith.addf %20, %21 : vector<8x8xf32>
    %c0_17 = arith.constant 0 : index
    %c0_18 = arith.constant 0 : index
    %23 = vector.load %arg8[%c0_17, %c0_18] : memref<8x8xf32, #tpu.memory_space<vmem>>, vector<8x8xf32>
    tpu.vector_store %arg8[%c0_17, %c0_18], %22 {strides = array<i32>} : memref<8x8xf32, #tpu.memory_space<vmem>>, vector<8x8xf32>,
    return
  }
  func.func @transform_0(%arg0: i32) -> (i32, i32) {
    %c0_i32 = arith.constant 0 : i32
    %c0_i32_0 = arith.constant 0 : i32
    return %arg0, %c0_i32 : i32, i32
  }
  func.func @transform_1(%arg0: i32) -> (i32, i32) {
    %c0_i32 = arith.constant 0 : i32
    %c0_i32_0 = arith.constant 0 : i32
    %c0_i32_1 = arith.constant 0 : i32
    return %c0_i32, %c0_i32_0 : i32, i32
  }
  func.func @transform_2(%arg0: i32) -> (i32, i32) {
    %c0_i32 = arith.constant 0 : i32
    %c0_i32_0 = arith.constant 0 : i32
    %c0_i32_1 = arith.constant 0 : i32
    return %c0_i32, %c0_i32_0 : i32, i32
  }
  func.func @transform_3(%arg0: i32) -> (i32, i32) {
    %c0_i32 = arith.constant 0 : i32
    %c0_i32_0 = arith.constant 0 : i32
    %c0_i32_1 = arith.constant 0 : i32
    return %c0_i32, %c0_i32_0 : i32, i32
  }
  func.func @transform_4(%arg0: i32) -> (i32, i32) {
    %c0_i32 = arith.constant 0 : i32
    %c0_i32_0 = arith.constant 0 : i32
    %c0_i32_1 = arith.constant 0 : i32
    return %c0_i32, %c0_i32_0 : i32, i32
  }
  func.func @transform_5(%arg0: i32) -> (i32, i32) {
    %c0_i32 = arith.constant 0 : i32
    %c0_i32_0 = arith.constant 0 : i32
    %c0_i32_1 = arith.constant 0 : i32
    return %c0_i32, %c0_i32_0 : i32, i32
  }
  func.func @transform_6(%arg0: i32) -> (i32, i32) {
    %c0_i32 = arith.constant 0 : i32
    %c0_i32_0 = arith.constant 0 : i32
    %c0_i32_1 = arith.constant 0 : i32
    return %c0_i32, %c0_i32_0 : i32, i32
  }
  func.func @transform_7(%arg0: i32) -> (i32, i32) {
    %c0_i32 = arith.constant 0 : i32
    %c0_i32_0 = arith.constant 0 : i32
    return %arg0, %c0_i32 : i32, i32
  }
}

</mosaic_0001>

<bundles_post_ra>
// kernel: abc_mlp_forward.1
= control target key start
LH: loop header
LB: loop body
LE: loop exit
PB: predicated region body
PF: predicated region fallthrough
CT: control target
= control target key end

     0   :  { %12 = vsyncpa [#allocation3], 0  ;;  %s451_s0 = inlined_call_operand.vmem [shape: f32[8,16], index: 0, kind: input, shape index: {}]   ;;  %s452_s1 = inlined_call_operand.hbm [shape: bf16[16,32], index: 1, kind: input, shape index: {}]   ;;  %s453_s2 = inlined_call_operand.vmem [shape: f32[1,32], index: 2, kind: input, shape index: {}]   ;;  %s454_s3 = inlined_call_operand.vmem [shape: bf16[32,32], index: 3, kind: input, shape index: {}]   ;;  %s455_s4 = inlined_call_operand.vmem [shape: f32[1,32], index: 4, kind: input, shape index: {}]   ;;  %s456_s5 = inlined_call_operand.vmem [shape: bf16[32,8], index: 5, kind: input, shape index: {}]   ;;  %s457_s6 = inlined_call_operand.vmem [shape: f32[1,8], index: 6, kind: input, shape index: {}]   ;;  %s458_s7 = inlined_call_operand.hbm [shape: f32[8,8], index: 7, kind: output, shape index: {}]  }
   0x1   :  { %13 = vsyncpa [#allocation4], 0  ;;  %s357_s24 = smov [#allocation2]   ;;  %s309_s28 = scalar_lea.hbm %s452_s1, 128 }
   0x2   :  { %s21_s25 = sshll.u32 %s357_s24, 4  ;;  %p310_p0 = scmp.ne.s32.totalorder %s452_s1, %s309_s28  ;;  %s22_s25 = int_to_ptr.vmem [resolvable:$true] %s21_s25 }
   0x3   :  { %p313_p1 = scmp.lt.u32.totalorder %s309_s28, %s452_s1 }
   0x5   :  { %p315_p2 = pnand %p313_p1, %p310_p0 }
   0x7   :  { %318 = shalt.err (!%p315_p2)
}
   0x8   :  { %s319_s10 = scalar_lea.vmem %s22_s25, 128  ;;  %p324_p4 = scmp.lt.s32.totalorder %s22_s25, %s22_s25 }
   0x9   :  { %p320_p3 = scmp.ne.s32.totalorder %s22_s25, %s319_s10  ;;  %p325_p5 = scmp.lt.s32.totalorder %s319_s10, %s319_s10 }
   0xb   :  { %p326_p6 = por %p325_p5, %p324_p4 }
   0xd   :  { %p327_p7 = pnand %p326_p6, %p320_p3 }
   0xf   :  { %330 = shalt.err (!%p327_p7)
}
  0x10   :  { %s358_s11 = smov 64   ;;  %s359_s12 = smov 4  }
  0x11   :  { %27 = dma.hbm_to_vmem [thread:$0]  %s452_s1, 128, %s22_s25, [#allocation3], %s358_s11, %s358_s11, %s359_s12  }
  0x12   :  { %353 = dma.done.wait [#allocation3], 128  }
  0x13   :  { %354 = vsyncadd [#allocation3], 4294967168  ;;  %v360_v0 = vmov 0.0   ;;  %vm361_vm0 = vmmov 0   ;;  %v304_v1 = vld [vmem:[#allocation2] sm:$0xff]   ;;  %vm59_vm1 = vcmask 130048  }
  0x14   :  { %276 = vmatprep.subr.bf16.mxu0 %v360_v0  ;;  %278 = vmatprep.mubr.msk.bf16.mxu0 %vm361_vm0, %v360_v0  ;;  %v42_v2 = vld [vmem:[%s451_s0] sm:$0xff]  ;;  %v306_v5 = vld [vmem:[%s454_s3 + $0x8] sm:$0xff]   ;;  %vm128_vm2 = vcmask 261120   ;;  %s362_s27 = smov [#allocation5]   ;;  %vm240_vm3 = vcmask 64512  }
  0x15   :  { %282 = vmatprep.subr.bf16.mxu1 %v360_v0  ;;  %286 = vmatprep.mubr.msk.bf16.mxu1 %vm361_vm0, %v360_v0  ;;  %v46_v3 = vpack.c.bf16 %v42_v2, %v42_v2  ;;  %v305_v4 = vld [vmem:[%s454_s3] sm:$0xff]   ;;  %v308_v15 = vld [vmem:[%s456_s5 + $0x8] sm:$0xff]   ;;  %s248_s28 = sshll.u32 %s362_s27, 4  ;;  %s249_s28 = int_to_ptr.vmem [resolvable:$true] %s248_s28 }
  0x16   :  { %277 = vmatpush3.bf16.msra.mxu0 %v304_v1  ;;  %283 = vmatpush3.bf16.msra.mxu1 %v305_v4  ;;  %v307_v6 = vld [vmem:[%s456_s5] sm:$0xff]   ;;  %p336_p9 = scmp.lt.s32.totalorder %s249_s28, %s249_s28 }
  0x17   :  { %290 = vmatprep.subr.bf16.mxu0 %v360_v0  ;;  %284 = vmatprep.subr.bf16.mxu1 %v360_v0  ;;  %v257_v7 = vld [vmem:[%s453_s2] ss:$0 sm:$0xff] }
  0x18   :  { %v260_v16 = vld [vmem:[%s455_s4] ss:$0 sm:$0xff]  ;;  %s331_s4 = scalar_lea.vmem %s249_s28, 128 }
  0x19   :  { %279 = vmatmul.mubr.msk.bf16.vlgmr.msra.gmra.mrb[0].mxu0 %vm59_vm1, %v46_v3  ;;  %v264_v24 = vld [vmem:[%s457_s6] ss:$0 sm:$0xff]  ;;  %p332_p8 = scmp.ne.s32.totalorder %s249_s28, %s331_s4  ;;  %p337_p10 = scmp.lt.s32.totalorder %s331_s4, %s331_s4 }
  0x1a   :  { %294 = vmatprep.mubr.msk.bf16.mxu0 %vm361_vm0, %v360_v0  ;;  %285 = vmatpush3.bf16.msra.mxu1 %v306_v5 }
  0x1b   :  { %291 = vmatpush3.bf16.msra.mxu0 %v307_v6  ;;  %p338_p11 = por %p337_p10, %p336_p9 }
  0x1c   :  { %292 = vmatprep.subr.bf16.mxu0 %v360_v0 }
  0x1d   :  { %p339_p12 = pnand %p338_p11, %p332_p8 }
  0x1f   :  { %293 = vmatpush3.bf16.msra.mxu0 %v308_v15 }
  0xec   :  { %v97_v8 = vpop.f32.mrb[0].mxu0 }
  0xed   :  { %v98_v9 = vadd.f32 %v257_v7, %v97_v8  ;;  %v280_v10 = vpop.f32.mrb[1].mxu0 }
  0xee   :  { %v100_v11 = vpop.f32.mrb[2].mxu0 }
  0xef   :  { %v103_v12 = vmax.f32 %v98_v9, 0.0  ;;  %v281_v13 = vpop.f32.mrb[3].mxu0 }
  0xf1   :  { %v109_v14 = vpack.c.bf16 %v103_v12, %v103_v12 }
  0xf3   :  { %287 = vmatmul.mubr.msk.bf16.vlgmr.msra.gmra.mrb[0].mxu1 %vm128_vm2, %v109_v14 }
 0x1c6   :  { %v166_v17 = vpop.f32.mrb[0].mxu1 }
 0x1c7   :  { %v167_v18 = vadd.f32 %v260_v16, %v166_v17  ;;  %v288_v19 = vpop.f32.mrb[1].mxu1 }
 0x1c8   :  { %v169_v20 = vpop.f32.mrb[2].mxu1 }
 0x1c9   :  { %v172_v21 = vmax.f32 %v167_v18, 0.0  ;;  %v289_v22 = vpop.f32.mrb[3].mxu1 }
 0x1cb   :  { %v178_v23 = vpack.c.bf16 %v172_v21, %v172_v21 }
 0x1cd   :  { %295 = vmatmul.mubr.msk.bf16.vlgmr.msra.gmra.mrb[4].mxu0 %vm128_vm2, %v178_v23 }
 0x2a0   :  { %v234_v25 = vpop.f32.mrb[4].mxu0 }
 0x2a1   :  { %v235_v26 = vadd.f32 %v264_v24, %v234_v25  ;;  %v296_v27 = vpop.f32.mrb[5].mxu0 }
 0x2a2   :  { %v237_v28 = vpop.f32.mrb[6].mxu0 }
 0x2a3   :  { %v297_v29 = vpop.f32.mrb[7].mxu0  ;;  %241 = vst.msk [vmem:[#allocation5] sm:$0xff] %vm240_vm3, %v235_v26 }
 0x2a4   :  { %342 = shalt.err (!%p339_p12)
}
 0x2a5   :  { %s343_s6 = scalar_lea.hbm %s458_s7, 128 }
 0x2a6   :  { %p344_p13 = scmp.ne.s32.totalorder %s458_s7, %s343_s6  ;;  %p347_p0 = scmp.lt.u32.totalorder %s343_s6, %s458_s7 }
 0x2a8   :  { %p349_p1 = pnand %p347_p0, %p344_p13 }
 0x2aa   :  { %352 = shalt.err (!%p349_p1)
}
 0x2ab   :  { %251 = dma.vmem_to_hbm [thread:$0]  %s249_s28, 128, %s458_s7, [#allocation4]  }
 0x2ac   :  { %355 = dma.done.wait [#allocation4], 128  }
 0x2ad   :  { %356 = vsyncadd [#allocation4], 4294967168 }
 0x2ae   :  { %255 = vsyncpa [#allocation3], 1 }
 0x2af   :  { %256 = vsyncpa [#allocation4], 1 }

</bundles_post_ra>
